<compile_context>
chip_gen: v7x
topology: tpu7x:2x2x1
jax: 0.10.0
libtpu: 0.0.40
codegen_flags: <defaults>
</compile_context>

<pallas_src>
import jax
import jax.numpy as jnp
from jax.experimental import pallas as pl
from jax.experimental.pallas import tpu as pltpu

LANE = 128          # TPU lane width
ROW_QUANTUM = 16    # batch-tile rounding quantum (bf16 sublane packing)
NEG_BIG = -1e30     # baked into b3 for padded logit lanes (exp underflows to exactly 0)


def _round_up(x, m):
    return (x + m - 1) // m * m


def policy_mlp_kernel(x_ref, w1_ref, b1_ref, w2_ref, b2_ref, w3_ref, b3_ref, o_ref):
    # Layer 1: f32 state -> bf16 on the VPU, MXU matmul with f32 accumulation, bias + ReLU in f32.
    x = x_ref[...].astype(w1_ref.dtype)
    h = jnp.dot(x, w1_ref[...], preferred_element_type=jnp.float32)
    h = jnp.maximum(h + b1_ref[...], 0.0)
    # Layer 2: Linear + ReLU (Dropout is identity in eval mode).
    h = jnp.dot(h.astype(w2_ref.dtype), w2_ref[...], preferred_element_type=jnp.float32)
    h = jnp.maximum(h + b2_ref[...], 0.0)
    # Output head: Linear + softmax. Padded lanes carry a -1e30 bias (baked into b3) and
    # zero w3 columns, so they contribute exactly 0 to the exp-sum — no in-kernel mask needed.
    logits = jnp.dot(h.astype(w3_ref.dtype), w3_ref[...], preferred_element_type=jnp.float32)
    logits = logits + b3_ref[...]
    m = jnp.max(logits, axis=-1, keepdims=True)
    e = jnp.exp(logits - m)
    # Exact divide (rows must sum to 1); the approx reciprocal was only ~1e-3 accurate.
    o_ref[...] = e / jnp.sum(e, axis=-1, keepdims=True)


def policy_network_forward(state, params, action_dim, *, tile_b=None):
    """Fused MLP forward. state: (batch, state_dim) f32. Returns (batch, action_dim) f32."""
    w1, b1, w2, b2, w3, b3 = params
    batch, state_dim = state.shape
    s_in, hidden = w1.shape
    a_pad = w3.shape[1]
    assert s_in == state_dim, "w1 must be stored (state_dim, hidden)"

    # One grid step for small batches; cap the tile so large batches still get multiple
    # grid steps (lets v7x shard the "parallel" batch axis across both TensorCores).
    if tile_b is None:
        tile_b = min(_round_up(batch, ROW_QUANTUM), 512)
    b_pad = _round_up(batch, tile_b)
    x = state
    if b_pad != batch:
        x = jnp.zeros((b_pad, state_dim), state.dtype).at[:batch].set(state)

    grid = (b_pad // tile_b,)

    flops = 2 * b_pad * (state_dim * hidden + hidden * hidden + hidden * a_pad)
    bytes_accessed = (x.size * x.dtype.itemsize
                      + sum(int(p.size) * p.dtype.itemsize for p in params)
                      + b_pad * a_pad * 4)

    out_padded = pl.pallas_call(
        policy_mlp_kernel,
        out_shape=jax.ShapeDtypeStruct((b_pad, a_pad), jnp.float32),
        grid_spec=pltpu.PrefetchScalarGridSpec(
            num_scalar_prefetch=0,
            grid=grid,
            in_specs=[
                # f32 activations stream over the batch; last dim = full state_dim (legal block).
                pl.BlockSpec((tile_b, state_dim), lambda i: (i, 0)),
                # Weights / biases are VMEM-resident across the grid (constant index maps).
                pl.BlockSpec((state_dim, hidden), lambda i: (0, 0)),
                pl.BlockSpec((1, hidden), lambda i: (0, 0)),
                pl.BlockSpec((hidden, hidden), lambda i: (0, 0)),
                pl.BlockSpec((1, hidden), lambda i: (0, 0)),
                pl.BlockSpec((hidden, a_pad), lambda i: (0, 0)),
                pl.BlockSpec((1, a_pad), lambda i: (0, 0)),
            ],
            # Lane-dense (tile_b, 128) output slab -> unmasked vst; sliced outside the kernel.
            out_specs=pl.BlockSpec((tile_b, a_pad), lambda i: (i, 0)),
        ),
        compiler_params=pltpu.CompilerParams(
            dimension_semantics=("parallel",)),
        cost_estimate=pl.CostEstimate(
            flops=flops,
            transcendentals=b_pad * a_pad,
            bytes_accessed=bytes_accessed),
    )(x, w1, b1, w2, b2, w3, b3)

    return out_padded[:batch, :action_dim]


def init_params(key, state_dim, action_dim, hidden_dim=128, w_dtype=jnp.bfloat16):
    """PyTorch-Linear-style uniform init.

    Weights stored (in_dim, out_dim) so the kernel computes x @ W + b (== x @ W_pt.T + b).
    w1 keeps its true K = state_dim (no lane padding needed on a contraction dim); hidden and
    action dims are padded to lane multiples with zero weights. The softmax mask for padded
    action lanes is baked into b3 as -1e30.
    """
    h_pad = _round_up(hidden_dim, LANE)
    a_pad = _round_up(action_dim, LANE)
    ks = jax.random.split(key, 6)

    def linear(kw, kb, fan_in, fan_out, in_pad, out_pad, pad_bias_value=0.0):
        bound = float(fan_in) ** -0.5
        w = jax.random.uniform(kw, (fan_in, fan_out), jnp.float32, -bound, bound)
        b = jax.random.uniform(kb, (fan_out,), jnp.float32, -bound, bound)
        w_p = jnp.zeros((in_pad, out_pad), jnp.float32).at[:fan_in, :fan_out].set(w)
        b_p = jnp.full((1, out_pad), pad_bias_value, jnp.float32).at[0, :fan_out].set(b)
        return w_p.astype(w_dtype), b_p

    w1, b1 = linear(ks[0], ks[1], state_dim, hidden_dim, state_dim, h_pad)
    w2, b2 = linear(ks[2], ks[3], hidden_dim, hidden_dim, h_pad, h_pad)
    # Padded logit lanes get a -1e30 bias -> exp underflows to 0 inside the kernel softmax.
    w3, b3 = linear(ks[4], ks[5], hidden_dim, action_dim, h_pad, a_pad,
                    pad_bias_value=NEG_BIG)
    return (w1, b1, w2, b2, w3, b3)


def reference_forward(state, params, action_dim):
    """Pure-JAX reference with the same bf16-rounded operands as the kernel's MXU path."""
    w1, b1, w2, b2, w3, b3 = params

    def bdot(a, w):
        return jnp.dot(a.astype(w.dtype).astype(jnp.float32),
                       w.astype(jnp.float32),
                       precision=jax.lax.Precision.HIGHEST)

    h = jnp.maximum(bdot(state, w1) + b1, 0.0)
    h = jnp.maximum(bdot(h, w2) + b2, 0.0)
    logits = (bdot(h, w3) + b3)[:, :action_dim]
    return jax.nn.softmax(logits, axis=-1)


if __name__ == "__main__":
    batch, state_dim, action_dim, hidden_dim = 32, 16, 8, 128  # module default hidden_dim=128

    key = jax.random.PRNGKey(0)
    k_state, k_params = jax.random.split(key)
    state = jax.random.normal(k_state, (batch, state_dim), dtype=jnp.float32)
    params = init_params(k_params, state_dim, action_dim, hidden_dim)

    out = jax.block_until_ready(policy_network_forward(state, params, action_dim))
    ref = reference_forward(state, params, action_dim)

    assert out.shape == (batch, action_dim)
    # Exact softmax divide in-kernel; tolerance covers bf16 MXU accumulation-order differences.
    assert bool(jnp.allclose(out, ref, atol=1e-3, rtol=1e-3))
    assert bool(jnp.allclose(jnp.sum(out, axis=-1), 1.0, atol=1e-3))

    print("KERNEL_OK")
</pallas_src>

<mosaic_0001>
module attributes {stable_mosaic.version = 11 : i64} {
  func.func @policy_mlp_kernel(%arg0: i32, %arg1: memref<32x16xf32, #tpu.memory_space<vmem>>, %arg2: memref<16x128xbf16, #tpu.memory_space<vmem>>, %arg3: memref<1x128xf32, #tpu.memory_space<vmem>>, %arg4: memref<128x128xbf16, #tpu.memory_space<vmem>>, %arg5: memref<1x128xf32, #tpu.memory_space<vmem>>, %arg6: memref<128x128xbf16, #tpu.memory_space<vmem>>, %arg7: memref<1x128xf32, #tpu.memory_space<vmem>>, %arg8: memref<32x128xf32, #tpu.memory_space<vmem>>) attributes {dimension_semantics = [#tpu.dimension_semantics<parallel>], iteration_bounds = array<i64: 1>, scalar_prefetch = 0 : i64, scratch_operands = 0 : i64, tpu.core_type = #tpu.core_type<tc>, window_params = [{transform_indices = @transform_0, window_bounds = array<i64: 32, 16>}, {pipeline_mode = #tpu.pipeline_mode<synchronous>, transform_indices = @transform_1, window_bounds = array<i64: 16, 128>}, {pipeline_mode = #tpu.pipeline_mode<synchronous>, transform_indices = @transform_2, window_bounds = array<i64: 1, 128>}, {pipeline_mode = #tpu.pipeline_mode<synchronous>, transform_indices = @transform_3, window_bounds = array<i64: 128, 128>}, {pipeline_mode = #tpu.pipeline_mode<synchronous>, transform_indices = @transform_4, window_bounds = array<i64: 1, 128>}, {pipeline_mode = #tpu.pipeline_mode<synchronous>, transform_indices = @transform_5, window_bounds = array<i64: 128, 128>}, {pipeline_mode = #tpu.pipeline_mode<synchronous>, transform_indices = @transform_6, window_bounds = array<i64: 1, 128>}, {transform_indices = @transform_7, window_bounds = array<i64: 32, 128>}]} {
    %c0 = arith.constant 0 : index
    %c0_0 = arith.constant 0 : index
    %0 = vector.load %arg1[%c0, %c0_0] : memref<32x16xf32, #tpu.memory_space<vmem>>, vector<32x16xf32>
    %1 = arith.truncf %0 : vector<32x16xf32> to vector<32x16xbf16>
    %c0_1 = arith.constant 0 : index
    %c0_2 = arith.constant 0 : index
    %2 = vector.load %arg2[%c0_1, %c0_2] : memref<16x128xbf16, #tpu.memory_space<vmem>>, vector<16x128xbf16>
    %cst = arith.constant dense<0.000000e+00> : vector<32x128xf32>
    %3 = tpu.matmul %1, %2, %cst {dimension_numbers = #tpu.dot_dimension_numbers<[1], [0], [0], [1], [0, 0, 1, 1], [], []>} : vector<32x16xbf16>, vector<16x128xbf16>, vector<32x128xf32> -> vector<32x128xf32>
    %c0_3 = arith.constant 0 : index
    %c0_4 = arith.constant 0 : index
    %4 = vector.load %arg3[%c0_3, %c0_4] : memref<1x128xf32, #tpu.memory_space<vmem>>, vector<1x128xf32>
    %5 = vector.broadcast %4 : vector<1x128xf32> to vector<32x128xf32>
    %6 = arith.addf %3, %5 : vector<32x128xf32>
    %cst_5 = arith.constant 0.000000e+00 : f32
    %7 = vector.broadcast %cst_5 : f32 to vector<32x128xf32>
    %8 = arith.maximumf %6, %7 : vector<32x128xf32>
    %9 = arith.truncf %8 : vector<32x128xf32> to vector<32x128xbf16>
    %c0_6 = arith.constant 0 : index
    %c0_7 = arith.constant 0 : index
    %10 = vector.load %arg4[%c0_6, %c0_7] : memref<128x128xbf16, #tpu.memory_space<vmem>>, vector<128x128xbf16>
    %cst_8 = arith.constant dense<0.000000e+00> : vector<32x128xf32>
    %11 = tpu.matmul %9, %10, %cst_8 {dimension_numbers = #tpu.dot_dimension_numbers<[1], [0], [0], [1], [0, 0, 1, 1], [], []>} : vector<32x128xbf16>, vector<128x128xbf16>, vector<32x128xf32> -> vector<32x128xf32>
    %c0_9 = arith.constant 0 : index
    %c0_10 = arith.constant 0 : index
    %12 = vector.load %arg5[%c0_9, %c0_10] : memref<1x128xf32, #tpu.memory_space<vmem>>, vector<1x128xf32>
    %13 = vector.broadcast %12 : vector<1x128xf32> to vector<32x128xf32>
    %14 = arith.addf %11, %13 : vector<32x128xf32>
    %cst_11 = arith.constant 0.000000e+00 : f32
    %15 = vector.broadcast %cst_11 : f32 to vector<32x128xf32>
    %16 = arith.maximumf %14, %15 : vector<32x128xf32>
    %17 = arith.truncf %16 : vector<32x128xf32> to vector<32x128xbf16>
    %c0_12 = arith.constant 0 : index
    %c0_13 = arith.constant 0 : index
    %18 = vector.load %arg6[%c0_12, %c0_13] : memref<128x128xbf16, #tpu.memory_space<vmem>>, vector<128x128xbf16>
    %cst_14 = arith.constant dense<0.000000e+00> : vector<32x128xf32>
    %19 = tpu.matmul %17, %18, %cst_14 {dimension_numbers = #tpu.dot_dimension_numbers<[1], [0], [0], [1], [0, 0, 1, 1], [], []>} : vector<32x128xbf16>, vector<128x128xbf16>, vector<32x128xf32> -> vector<32x128xf32>
    %c0_15 = arith.constant 0 : index
    %c0_16 = arith.constant 0 : index
    %20 = vector.load %arg7[%c0_15, %c0_16] : memref<1x128xf32, #tpu.memory_space<vmem>>, vector<1x128xf32>
    %21 = vector.broadcast %20 : vector<1x128xf32> to vector<32x128xf32>
    %22 = arith.addf %19, %21 : vector<32x128xf32>
    %cst_17 = arith.constant dense<0xFF800000> : vector<32xf32>
    %23 = vector.multi_reduction <maximumf>, %22, %cst_17 [1] : vector<32x128xf32> to vector<32xf32>
    %24 = vector.shape_cast %23 : vector<32xf32> to vector<32x1xf32>
    %25 = vector.broadcast %24 : vector<32x1xf32> to vector<32x128xf32>
    %26 = arith.subf %22, %25 : vector<32x128xf32>
    %27 = math.exp %26 : vector<32x128xf32>
    %cst_18 = arith.constant dense<0.000000e+00> : vector<32xf32>
    %28 = vector.multi_reduction <add>, %27, %cst_18 [1] : vector<32x128xf32> to vector<32xf32>
    %29 = vector.shape_cast %28 : vector<32xf32> to vector<32x1xf32>
    %30 = vector.broadcast %29 : vector<32x1xf32> to vector<32x128xf32>
    %31 = arith.divf %27, %30 : vector<32x128xf32>
    %c0_19 = arith.constant 0 : index
    %c0_20 = arith.constant 0 : index
    %32 = vector.load %arg8[%c0_19, %c0_20] : memref<32x128xf32, #tpu.memory_space<vmem>>, vector<32x128xf32>
    tpu.vector_store %arg8[%c0_19, %c0_20], %31 {strides = array<i32>} : memref<32x128xf32, #tpu.memory_space<vmem>>, vector<32x128xf32>,
    return
  }
  func.func @transform_0(%arg0: i32) -> (i32, i32) {
    %c0_i32 = arith.constant 0 : i32
    %c0_i32_0 = arith.constant 0 : i32
    return %arg0, %c0_i32 : i32, i32
  }
  func.func @transform_1(%arg0: i32) -> (i32, i32) {
    %c0_i32 = arith.constant 0 : i32
    %c0_i32_0 = arith.constant 0 : i32
    %c0_i32_1 = arith.constant 0 : i32
    return %c0_i32, %c0_i32_0 : i32, i32
  }
  func.func @transform_2(%arg0: i32) -> (i32, i32) {
    %c0_i32 = arith.constant 0 : i32
    %c0_i32_0 = arith.constant 0 : i32
    %c0_i32_1 = arith.constant 0 : i32
    return %c0_i32, %c0_i32_0 : i32, i32
  }
  func.func @transform_3(%arg0: i32) -> (i32, i32) {
    %c0_i32 = arith.constant 0 : i32
    %c0_i32_0 = arith.constant 0 : i32
    %c0_i32_1 = arith.constant 0 : i32
    return %c0_i32, %c0_i32_0 : i32, i32
  }
  func.func @transform_4(%arg0: i32) -> (i32, i32) {
    %c0_i32 = arith.constant 0 : i32
    %c0_i32_0 = arith.constant 0 : i32
    %c0_i32_1 = arith.constant 0 : i32
    return %c0_i32, %c0_i32_0 : i32, i32
  }
  func.func @transform_5(%arg0: i32) -> (i32, i32) {
    %c0_i32 = arith.constant 0 : i32
    %c0_i32_0 = arith.constant 0 : i32
    %c0_i32_1 = arith.constant 0 : i32
    return %c0_i32, %c0_i32_0 : i32, i32
  }
  func.func @transform_6(%arg0: i32) -> (i32, i32) {
    %c0_i32 = arith.constant 0 : i32
    %c0_i32_0 = arith.constant 0 : i32
    %c0_i32_1 = arith.constant 0 : i32
    return %c0_i32, %c0_i32_0 : i32, i32
  }
  func.func @transform_7(%arg0: i32) -> (i32, i32) {
    %c0_i32 = arith.constant 0 : i32
    %c0_i32_0 = arith.constant 0 : i32
    return %arg0, %c0_i32 : i32, i32
  }
}

</mosaic_0001>

<bundles_post_ra>
// kernel: tpu_custom_call.1
= control target key start
LH: loop header
LB: loop body
LE: loop exit
PB: predicated region body
PF: predicated region fallthrough
CT: control target
= control target key end

     0   :  { %12 = vsyncpa [#allocation3], 0  ;;  %s774_s0 = inlined_call_operand.vmem [shape: f32[32,16], index: 0, kind: input, shape index: {}]   ;;  %s775_s1 = inlined_call_operand.hbm [shape: bf16[16,128], index: 1, kind: input, shape index: {}]   ;;  %s776_s2 = inlined_call_operand.vmem [shape: f32[1,128], index: 2, kind: input, shape index: {}]   ;;  %s777_s3 = inlined_call_operand.hbm [shape: bf16[128,128], index: 3, kind: input, shape index: {}]   ;;  %s778_s4 = inlined_call_operand.vmem [shape: f32[1,128], index: 4, kind: input, shape index: {}]   ;;  %s779_s5 = inlined_call_operand.vmem [shape: bf16[128,128], index: 5, kind: input, shape index: {}]   ;;  %s780_s6 = inlined_call_operand.vmem [shape: f32[1,128], index: 6, kind: input, shape index: {}]   ;;  %s781_s7 = inlined_call_operand.hbm [shape: f32[32,128], index: 7, kind: output, shape index: {}]  }
   0x1   :  { %13 = vsyncpa [#allocation6], 0 }
   0x2   :  { %14 = vsyncpa [#allocation4], 0  ;;  %s646_s24 = smov [#allocation2]   ;;  %s574_s28 = scalar_lea.hbm %s775_s1, 128 }
   0x3   :  { %s22_s25 = sshll.u32 %s646_s24, 4  ;;  %p575_p0 = scmp.ne.s32.totalorder %s775_s1, %s574_s28  ;;  %s23_s25 = int_to_ptr.vmem [resolvable:$true] %s22_s25 }
   0x4   :  { %p578_p1 = scmp.lt.u32.totalorder %s574_s28, %s775_s1 }
   0x6   :  { %p580_p2 = pnand %p578_p1, %p575_p0 }
   0x8   :  { %583 = shalt.err (!%p580_p2)
}
   0x9   :  { %s584_s10 = scalar_lea.vmem %s23_s25, 128  ;;  %p589_p4 = scmp.lt.s32.totalorder %s23_s25, %s23_s25 }
   0xa   :  { %p585_p3 = scmp.ne.s32.totalorder %s23_s25, %s584_s10  ;;  %p590_p5 = scmp.lt.s32.totalorder %s584_s10, %s584_s10 }
   0xc   :  { %p591_p6 = por %p590_p5, %p589_p4 }
   0xe   :  { %p592_p7 = pnand %p591_p6, %p585_p3 }
  0x10   :  { %595 = shalt.err (!%p592_p7)
}
  0x11   :  { %s647_s11 = smov 64   ;;  %s648_s12 = smov 4  }
  0x12   :  { %28 = dma.hbm_to_vmem [thread:$0]  %s775_s1, 128, %s23_s25, [#allocation3], %s647_s11, %s647_s11, %s648_s12  }
  0x13   :  { %s649_s15 = smov [#allocation5]   ;;  %s596_s19 = scalar_lea.hbm %s777_s3, 1024 }
  0x14   :  { %s36_s16 = sshll.u32 %s649_s15, 4  ;;  %p597_p8 = scmp.ne.s32.totalorder %s777_s3, %s596_s19  ;;  %s37_s16 = int_to_ptr.vmem [resolvable:$true] %s36_s16 }
  0x15   :  { %p600_p9 = scmp.lt.u32.totalorder %s596_s19, %s777_s3 }
  0x17   :  { %p602_p10 = pnand %p600_p9, %p597_p8 }
  0x19   :  { %605 = shalt.err (!%p602_p10)
}
  0x1a   :  { %s606_s24 = scalar_lea.vmem %s37_s16, 1024  ;;  %p611_p12 = scmp.lt.s32.totalorder %s37_s16, %s37_s16 }
  0x1b   :  { %p607_p11 = scmp.ne.s32.totalorder %s37_s16, %s606_s24  ;;  %p612_p13 = scmp.lt.s32.totalorder %s606_s24, %s606_s24 }
  0x1d   :  { %p613_p0 = por %p612_p13, %p611_p12 }
  0x1f   :  { %p614_p1 = pnand %p613_p0, %p607_p11 }
  0x21   :  { %617 = shalt.err (!%p614_p1)
}
  0x22   :  { %42 = dma.hbm_to_vmem [thread:$0]  %s777_s3, 1024, %s37_s16, [#allocation6], %s647_s11, %s647_s11, %s648_s12  }
  0x23   :  { %640 = dma.done.wait [#allocation3], 128  }
  0x24   :  { %641 = vsyncadd [#allocation3], 4294967168 }
  0x25   :  { %642 = dma.done.wait [#allocation6], 1024  }
  0x26   :  { %643 = vsyncadd [#allocation6], 4294966272  ;;  %v541_v0 = vld [vmem:[#allocation2] sm:$0xff]   ;;  %v57_v2 = vld [vmem:[%s774_s0 + $0x8] sm:$0xff]  ;;  %vm77_vm0 = vcmask 130048  }
  0x27   :  { %v56_v1 = vld [vmem:[%s774_s0] sm:$0xff]  ;;  %v58_v3 = vld [vmem:[%s774_s0 + $0x10] sm:$0xff]  ;;  %488 = vmatprep.subr.bf16.mxu0 %v541_v0  ;;  %v59_v5 = vld [vmem:[%s774_s0 + $0x18] sm:$0xff] }
  0x28   :  { %v60_v4 = vpack.c.bf16 %v57_v2, %v56_v1  ;;  %489 = vmatpush3.bf16.msra.mxu0 %v541_v0  ;;  %v61_v6 = vpack.c.bf16 %v59_v5, %v58_v3  ;;  %v542_v7 = vld [vmem:[#allocation5] sm:$0xff]   ;;  %v543_v8 = vld [vmem:[#allocation5 + $0x8] sm:$0xff]   ;;  %v544_v9 = vld [vmem:[#allocation5 + $0x10] sm:$0xff]  }
  0x29   :  { %494 = vmatprep.subr.bf16.mxu1 %v542_v7  ;;  %v545_v10 = vld [vmem:[#allocation5 + $0x18] sm:$0xff]   ;;  %v546_v11 = vld [vmem:[#allocation5 + $0x20] sm:$0xff]   ;;  %v547_v12 = vld [vmem:[#allocation5 + $0x28] sm:$0xff]  }
  0x2a   :  { %490 = vmatprep.mubr.msk.bf16.mxu0 %vm77_vm0, %v60_v4  ;;  %495 = vmatpush3.bf16.msra.mxu1 %v542_v7  ;;  %v548_v13 = vld [vmem:[#allocation5 + $0x30] sm:$0xff]   ;;  %v549_v14 = vld [vmem:[#allocation5 + $0x38] sm:$0xff]   ;;  %v551_v16 = vld [vmem:[%s779_s5 + $0x8] sm:$0xff]  }
  0x2b   :  { %491 = vmatmul.mubr.msk.bf16.vlgmr.msra.gmra.mrb[0].mxu0 %vm77_vm0, %v61_v6  ;;  %496 = vmatprep.subr.bf16.mxu1 %v543_v8  ;;  %v550_v15 = vld [vmem:[%s779_s5] sm:$0xff]   ;;  %v552_v17 = vld [vmem:[%s779_s5 + $0x10] sm:$0xff]   ;;  %v553_v18 = vld [vmem:[%s779_s5 + $0x18] sm:$0xff]  }
  0x2c   :  { %514 = vmatprep.subr.bf16.mxu0 %v550_v15  ;;  %v554_v19 = vld [vmem:[%s779_s5 + $0x20] sm:$0xff]   ;;  %v555_v20 = vld [vmem:[%s779_s5 + $0x28] sm:$0xff]   ;;  %v556_v36 = vld [vmem:[%s779_s5 + $0x30] sm:$0xff]  }
  0x2d   :  { %515 = vmatpush3.bf16.msra.mxu0 %v550_v15  ;;  %v443_v21 = vld [vmem:[%s776_s2] ss:$0 sm:$0xff]  ;;  %v557_v37 = vld [vmem:[%s779_s5 + $0x38] sm:$0xff]  }
  0x2e   :  { %497 = vmatpush3.bf16.msra.mxu1 %v543_v8  ;;  %516 = vmatprep.subr.bf16.mxu0 %v551_v16  ;;  %v447_v38 = vld [vmem:[%s778_s4] ss:$0 sm:$0xff]  ;;  %s650_s4 = smov [#allocation7]  }
  0x2f   :  { %498 = vmatprep.subr.bf16.mxu1 %v544_v9  ;;  %v456_v53 = vld [vmem:[%s780_s6] ss:$0 sm:$0xff]  ;;  %s430_s6 = sshll.u32 %s650_s4, 4  ;;  %s431_s6 = int_to_ptr.vmem [resolvable:$true] %s430_s6 }
  0x30   :  { %s618_s28 = scalar_lea.vmem %s431_s6, 512  ;;  %p623_p3 = scmp.lt.s32.totalorder %s431_s6, %s431_s6 }
  0x31   :  { %517 = vmatpush3.bf16.msra.mxu0 %v551_v16  ;;  %p619_p2 = scmp.ne.s32.totalorder %s431_s6, %s618_s28  ;;  %p624_p4 = scmp.lt.s32.totalorder %s618_s28, %s618_s28 }
  0x32   :  { %499 = vmatpush3.bf16.msra.mxu1 %v544_v9  ;;  %518 = vmatprep.subr.bf16.mxu0 %v552_v17 }
  0x33   :  { %500 = vmatprep.subr.bf16.mxu1 %v545_v10  ;;  %p625_p5 = por %p624_p4, %p623_p3 }
  0x35   :  { %519 = vmatpush3.bf16.msra.mxu0 %v552_v17  ;;  %p626_p6 = pnand %p625_p5, %p619_p2 }
  0x36   :  { %501 = vmatpush3.bf16.msra.mxu1 %v545_v10  ;;  %520 = vmatprep.subr.bf16.mxu0 %v553_v18 }
  0x37   :  { %502 = vmatprep.subr.bf16.mxu1 %v546_v11 }
  0x39   :  { %521 = vmatpush3.bf16.msra.mxu0 %v553_v18 }
  0x3a   :  { %503 = vmatpush3.bf16.msra.mxu1 %v546_v11  ;;  %522 = vmatprep.subr.bf16.mxu0 %v554_v19 }
  0x3b   :  { %504 = vmatprep.subr.bf16.mxu1 %v547_v12 }
  0x3d   :  { %523 = vmatpush3.bf16.msra.mxu0 %v554_v19 }
  0x3e   :  { %505 = vmatpush3.bf16.msra.mxu1 %v547_v12  ;;  %524 = vmatprep.subr.bf16.mxu0 %v555_v20 }
  0x3f   :  { %506 = vmatprep.subr.bf16.mxu1 %v548_v13 }
  0x41   :  { %525 = vmatpush3.bf16.msra.mxu0 %v555_v20 }
  0x42   :  { %507 = vmatpush3.bf16.msra.mxu1 %v548_v13  ;;  %526 = vmatprep.subr.bf16.mxu0 %v556_v36 }
  0x43   :  { %508 = vmatprep.subr.bf16.mxu1 %v549_v14 }
  0x45   :  { %527 = vmatpush3.bf16.msra.mxu0 %v556_v36 }
  0x46   :  { %509 = vmatpush3.bf16.msra.mxu1 %v549_v14  ;;  %528 = vmatprep.subr.bf16.mxu0 %v557_v37 }
  0x49   :  { %529 = vmatpush3.bf16.msra.mxu0 %v557_v37 }
  0xfe   :  { %v492_v22 = vpop.f32.mrb[0].mxu0 }
  0xff   :  { %v127_v23 = vadd.f32 %v492_v22, %v443_v21  ;;  %v118_v24 = vpop.f32.mrb[1].mxu0 }
 0x100   :  { %v119_v25 = vadd.f32 %v443_v21, %v118_v24  ;;  %v493_v26 = vpop.f32.mrb[2].mxu0 }
 0x101   :  { %v130_v27 = vadd.f32 %v493_v26, %v443_v21  ;;  %v121_v28 = vpop.f32.mrb[3].mxu0  ;;  %v135_v30 = vmax.f32 %v127_v23, 0.0 }
 0x102   :  { %v122_v29 = vadd.f32 %v443_v21, %v121_v28  ;;  %v133_v32 = vmax.f32 %v119_v25, 0.0 }
 0x103   :  { %v136_v31 = vmax.f32 %v130_v27, 0.0 }
 0x104   :  { %v134_v33 = vmax.f32 %v122_v29, 0.0 }
 0x105   :  { %v138_v34 = vpack.c.bf16 %v136_v31, %v135_v30 }
 0x106   :  { %v137_v35 = vpack.c.bf16 %v134_v33, %v133_v32 }
 0x108   :  { %510 = vmatprep.mubr.bf16.mxu1 %v137_v35 }
 0x109   :  { %511 = vmatmul.mubr.bf16.vlgmr.msra.gmra.mrb[0].mxu1 %v138_v34 }
 0x1dc   :  { %v512_v39 = vpop.f32.mrb[0].mxu1 }
 0x1dd   :  { %v253_v40 = vadd.f32 %v512_v39, %v447_v38  ;;  %v244_v41 = vpop.f32.mrb[1].mxu1 }
 0x1de   :  { %v245_v42 = vadd.f32 %v447_v38, %v244_v41  ;;  %v513_v43 = vpop.f32.mrb[2].mxu1 }
 0x1df   :  { %v256_v44 = vadd.f32 %v513_v43, %v447_v38  ;;  %v247_v45 = vpop.f32.mrb[3].mxu1  ;;  %v261_v47 = vmax.f32 %v253_v40, 0.0 }
 0x1e0   :  { %v248_v46 = vadd.f32 %v447_v38, %v247_v45  ;;  %v259_v49 = vmax.f32 %v245_v42, 0.0 }
 0x1e1   :  { %v262_v48 = vmax.f32 %v256_v44, 0.0 }
 0x1e2   :  { %v260_v50 = vmax.f32 %v248_v46, 0.0 }
 0x1e3   :  { %v264_v51 = vpack.c.bf16 %v262_v48, %v261_v47 }
 0x1e4   :  { %v263_v52 = vpack.c.bf16 %v260_v50, %v259_v49 }
 0x1e6   :  { %530 = vmatprep.mubr.bf16.mxu0 %v263_v52 }
 0x1e7   :  { %531 = vmatmul.mubr.bf16.vlgmr.msra.gmra.mrb[4].mxu0 %v264_v51 }
 0x2ba   :  { %v532_v54 = vpop.f32.mrb[4].mxu0 }
 0x2bb   :  { %v379_v55 = vadd.f32 %v532_v54, %v456_v53  ;;  %v370_v56 = vpop.f32.mrb[5].mxu0 }
 0x2bc   :  { %v371_v57 = vadd.f32 %v456_v53, %v370_v56  ;;  %v533_v58 = vpop.f32.mrb[6].mxu0 }
 0x2bd   :  { %389 = vmax.xlane.f32.xlu1 %v379_v55  ;;  %v373_v59 = vpop.f32.mrb[7].mxu0  ;;  %v382_v60 = vadd.f32 %v533_v58, %v456_v53 }
 0x2be   :  { %385 = vmax.xlane.f32.xlu0 %v371_v57  ;;  %v374_v61 = vadd.f32 %v456_v53, %v373_v59 }
 0x2c1   :  { %391 = vmax.xlane.f32.xlu1 %v382_v60 }
 0x2c2   :  { %387 = vmax.xlane.f32.xlu0 %v374_v61 }
 0x34a   :  { %v390_v62 = vpop.xlane.xlu1 %389 }
 0x34b   :  { %v395_v63 = vsub.f32 %v379_v55, %v390_v62  ;;  %v386_v0 = vpop.xlane.xlu0 %385 }
 0x34c   :  { %v393_v1 = vsub.f32 %v371_v57, %v386_v0 }
 0x34d   :  { %v401_v4 = vmul.f32 1.442695, %v395_v63 }
 0x34e   :  { %v397_v2 = vmul.f32 1.442695, %v393_v1  ;;  %v392_v3 = vpop.xlane.xlu1 %391 }
 0x34f   :  { %v388_v5 = vpop.xlane.xlu0 %387  ;;  %v396_v6 = vsub.f32 %v382_v60, %v392_v3 }
 0x350   :  { %558 = vpow2.f32 %v397_v2  ;;  %v394_v7 = vsub.f32 %v374_v61, %v388_v5 }
 0x351   :  { %560 = vpow2.f32 %v401_v4  ;;  %v403_v9 = vmul.f32 1.442695, %v396_v6 }
 0x352   :  { %v399_v8 = vmul.f32 1.442695, %v394_v7 }
 0x354   :  { %562 = vpow2.f32 %v399_v8 }
 0x355   :  { %564 = vpow2.f32 %v403_v9 }
 0x35a   :  { %v559_v10 = vpop.eup %558 }
 0x35b   :  { %405 = vadd.xlane.f32.xlu0 %v559_v10  ;;  %v561_v11 = vpop.eup %560 }
 0x35e   :  { %v563_v12 = vpop.eup %562 }
 0x35f   :  { %409 = vadd.xlane.f32.xlu0 %v561_v11  ;;  %407 = vadd.xlane.f32.xlu1 %v563_v12  ;;  %v565_v13 = vpop.eup %564 }
 0x363   :  { %411 = vadd.xlane.f32.xlu1 %v565_v13 }
 0x3e8   :  { %v406_v14 = vpop.xlane.xlu0 %405 }
 0x3e9   :  { %566 = vrcp.f32 %v406_v14 }
 0x3ec   :  { %v408_v15 = vpop.xlane.xlu1 %407  ;;  %v410_v16 = vpop.xlane.xlu0 %409 }
 0x3ed   :  { %568 = vrcp.f32 %v408_v15 }
 0x3ee   :  { %570 = vrcp.f32 %v410_v16 }
 0x3f0   :  { %v412_v17 = vpop.xlane.xlu1 %411 }
 0x3f1   :  { %572 = vrcp.f32 %v412_v17 }
 0x3f3   :  { %v567_v18 = vpop.eup %566 }
 0x3f4   :  { %v414_v19 = vmul.f32 %v567_v18, %v559_v10 }
 0x3f6   :  { %421 = vst [vmem:[#allocation7] sm:$0xff] %v414_v19 }
 0x3f7   :  { %v569_v20 = vpop.eup %568 }
 0x3f8   :  { %v571_v21 = vpop.eup %570  ;;  %v416_v22 = vmul.f32 %v569_v20, %v563_v12 }
 0x3f9   :  { %v418_v23 = vmul.f32 %v571_v21, %v561_v11 }
 0x3fa   :  { %422 = vst [vmem:[#allocation7 + $0x8] sm:$0xff] %v416_v22 }
 0x3fb   :  { %v573_v24 = vpop.eup %572  ;;  %423 = vst [vmem:[#allocation7 + $0x10] sm:$0xff] %v418_v23 }
 0x3fc   :  { %v420_v25 = vmul.f32 %v573_v24, %v565_v13 }
 0x3fe   :  { %424 = vst [vmem:[#allocation7 + $0x18] sm:$0xff] %v420_v25 }
 0x3ff   :  { %629 = shalt.err (!%p626_p6)
}
 0x400   :  { %s630_s8 = scalar_lea.hbm %s781_s7, 512 }
 0x401   :  { %p631_p7 = scmp.ne.s32.totalorder %s781_s7, %s630_s8  ;;  %p634_p8 = scmp.lt.u32.totalorder %s630_s8, %s781_s7 }
 0x403   :  { %p636_p9 = pnand %p634_p8, %p631_p7 }
 0x405   :  { %639 = shalt.err (!%p636_p9)
}
 0x406   :  { %s651_s11 = smov 128   ;;  %s652_s12 = smov 8  }
 0x407   :  { %436 = dma.vmem_to_hbm [thread:$0]  %s431_s6, 512, %s781_s7, [#allocation4], %s651_s11, %s651_s11, %s652_s12  }
 0x408   :  { %644 = dma.done.wait [#allocation4], 512  }
 0x409   :  { %645 = vsyncadd [#allocation4], 4294966784 }
 0x40a   :  { %440 = vsyncpa [#allocation3], 1 }
 0x40b   :  { %441 = vsyncpa [#allocation6], 1 }
 0x40c   :  { %442 = vsyncpa [#allocation4], 1 }

</bundles_post_ra>
